<compile_context>
chip_gen: v7x
topology: tpu7x:2x2x1
jax: 0.10.0
libtpu: 0.0.40
codegen_flags: <defaults>
</compile_context>

<pallas_src>
import jax
import jax.numpy as jnp
from jax.experimental import pallas as pl
from jax.experimental.pallas import tpu as pltpu


# ---------------------------------------------------------------------------
# Fused Pallas kernel: gcn1 + leaky_relu + gcn2 + flatten-linear, whole batch
# ---------------------------------------------------------------------------
def gcn_fused_kernel(x_ref, k1_ref, b1_ref, k2_ref, b2_ref, w3_ref, b3_ref,
                     o_ref):
    x = x_ref[...]                                       # (B, N*F) node-major flat
    # gcn1 (message passing folded into k1 = kron(Â^T, W1)):
    h1 = jnp.dot(x, k1_ref[...],
                 preferred_element_type=jnp.float32) + b1_ref[...]
    h1 = jnp.where(h1 >= 0.0, h1, 0.1 * h1)              # leaky_relu(0.1)
    # gcn2 (k2 = kron(Â^T, W2)) -> already node-major flattened (B, N*E):
    h2 = jnp.dot(h1, k2_ref[...],
                 preferred_element_type=jnp.float32) + b2_ref[...]
    # gcn3: Linear over the node-major flatten; K = N*E = 128, lane-aligned:
    out = jnp.dot(h2, w3_ref[...],
                  preferred_element_type=jnp.float32) + b3_ref[...]
    o_ref[...] = out                                     # one lane-dense (B, O) store


# ---------------------------------------------------------------------------
# Glue
# ---------------------------------------------------------------------------
def build_raw_adj(edge_index, num_nodes):
    # TODO(synk): data-dependent scatter-add (edge_index message passing) has
    # no clean Pallas TPU equivalent; kept as a single XLA scatter.
    src = edge_index[0]
    dst = edge_index[1]
    a = jnp.zeros((num_nodes, num_nodes), jnp.float32)
    return a.at[dst, src].add(1.0)


def fold_graph_params(edge_index, params, num_nodes):
    """Normalize Â once and fold it into the per-layer dense weights."""
    N = num_nodes
    a = build_raw_adj(edge_index, N)
    a = a + jnp.eye(N, dtype=jnp.float32)                # add self-loops
    deg = jnp.sum(a, axis=1)
    dinv = jnp.where(deg > 0.0, jax.lax.rsqrt(deg), 0.0)  # select, not mask-mul
    a_hat = a * dinv[:, None] * dinv[None, :]            # Â = D^-1/2 (A+I) D^-1/2

    # flatten(Â X W) == flatten(X) @ kron(Â^T, W)
    k1 = jnp.kron(a_hat.T, params["w1"])                 # (N*F, N*F)
    k2 = jnp.kron(a_hat.T, params["w2"])                 # (N*F, N*E)
    b1t = jnp.tile(params["b1"], (1, N))                 # (1, N*F)
    b2t = jnp.tile(params["b2"], (1, N))                 # (1, N*E)
    return k1, b1t, k2, b2t


def gcn_forward(nodes, edges, params, gcn_emb_dim, gcn_nodes_num, n_embd):
    """nodes: (N, 3) single graph or (B, N, 3) batch of graphs sharing edges[0]."""
    if nodes.ndim == 2:
        nodes = nodes[None]
    B, N, F = nodes.shape
    E, O = gcn_emb_dim, n_embd
    assert N == gcn_nodes_num

    k1, b1t, k2, b2t = fold_graph_params(edges[0], params, N)
    x_flat = nodes.reshape(B, N * F)                      # node-major flatten / graph

    # Single grid step: whole batch in one kernel invocation (overhead-bound
    # regime -> avoid per-step pipeline cost).  On v7x one could use grid=(2,)
    # with dimension_semantics=("parallel",) and B/2 graphs per step.
    out = pl.pallas_call(
        gcn_fused_kernel,
        out_shape=jax.ShapeDtypeStruct((B, O), jnp.float32),
        grid=(1,),
        in_specs=[
            pl.BlockSpec((B, N * F), lambda i: (0, 0)),   # flattened node features
            pl.BlockSpec((N * F, N * F), lambda i: (0, 0)),   # kron(Â^T, W1)
            pl.BlockSpec((1, N * F), lambda i: (0, 0)),       # tiled b1
            pl.BlockSpec((N * F, N * E), lambda i: (0, 0)),   # kron(Â^T, W2)
            pl.BlockSpec((1, N * E), lambda i: (0, 0)),       # tiled b2
            pl.BlockSpec((N * E, O), lambda i: (0, 0)),       # W3 (original layout)
            pl.BlockSpec((1, O), lambda i: (0, 0)),           # b3
        ],
        out_specs=pl.BlockSpec((B, O), lambda i: (0, 0)),
    )(x_flat, k1, b1t, k2, b2t, params["w3"], params["b3"])

    return out                                            # (B, n_embd)


# ---------------------------------------------------------------------------
# Pure-JAX reference (original math: explicit normalized adjacency per graph)
# ---------------------------------------------------------------------------
def reference_forward(nodes, edges, params, gcn_emb_dim, gcn_nodes_num, n_embd):
    if nodes.ndim == 2:
        nodes = nodes[None]
    N = gcn_nodes_num
    edge_index = edges[0]
    a = jnp.zeros((N, N), jnp.float32).at[edge_index[1], edge_index[0]].add(1.0)
    a = a + jnp.eye(N, dtype=jnp.float32)
    deg = a.sum(axis=1)
    dinv = jnp.where(deg > 0.0, 1.0 / jnp.sqrt(deg), 0.0)
    adj = a * dinv[:, None] * dinv[None, :]
    P = jax.lax.Precision.HIGHEST

    def one(x):
        h1 = jnp.dot(adj, jnp.dot(x, params["w1"], precision=P),
                     precision=P) + params["b1"]
        h1 = jnp.where(h1 >= 0.0, h1, 0.1 * h1)
        h2 = jnp.dot(adj, jnp.dot(h1, params["w2"], precision=P),
                     precision=P) + params["b2"]
        flat = h2.reshape(1, gcn_emb_dim * gcn_nodes_num)
        return (jnp.dot(flat, params["w3"], precision=P) + params["b3"])[0]

    return jax.vmap(one)(nodes)


# ---------------------------------------------------------------------------
if __name__ == "__main__":
    gcn_nodes_num = 16     # N
    gcn_emb_dim = 8        # E   (N*E = 128, lane-aligned final contraction)
    n_embd = 32            # O
    num_edges = 24
    in_feat = 3            # GCNConv(3, .)
    batch = 4              # graphs fused into one kernel launch

    key = jax.random.PRNGKey(0)
    k_nodes, k_src, k_off, k_w1, k_w2, k_w3, k_b3 = jax.random.split(key, 7)

    # Inputs: batch of graphs sharing one edge_index (matches torch `edges[0]`)
    nodes = jax.random.normal(k_nodes, (batch, gcn_nodes_num, in_feat),
                              dtype=jnp.float32)
    src = jax.random.randint(k_src, (num_edges,), 0, gcn_nodes_num)
    off = jax.random.randint(k_off, (num_edges,), 1, gcn_nodes_num)
    dst = (src + off) % gcn_nodes_num                    # no self-loops in raw edges
    edges = jnp.stack([src, dst]).astype(jnp.int32)[None]    # (1, 2, num_edges)

    # Deterministic parameters (shapes from GCN.__init__)
    params = {
        # gcn1 = GCNConv(3, 3): weight (in, out), bias (out,)
        "w1": 0.3 * jax.random.normal(k_w1, (in_feat, in_feat), dtype=jnp.float32),
        "b1": jnp.zeros((1, in_feat), dtype=jnp.float32),
        # gcn2 = GCNConv(3, gcn_emb_dim)
        "w2": 0.3 * jax.random.normal(k_w2, (in_feat, gcn_emb_dim), dtype=jnp.float32),
        "b2": jnp.zeros((1, gcn_emb_dim), dtype=jnp.float32),
        # gcn3 = nn.Linear(gcn_emb_dim * gcn_nodes_num, n_embd); stored as (in, out)
        "w3": 0.1 * jax.random.normal(
            k_w3, (gcn_emb_dim * gcn_nodes_num, n_embd), dtype=jnp.float32),
        "b3": 0.1 * jax.random.normal(k_b3, (1, n_embd), dtype=jnp.float32),
    }

    # Batched fused kernel
    out = gcn_forward(nodes, edges, params, gcn_emb_dim, gcn_nodes_num, n_embd)
    out = jax.block_until_ready(out)
    ref = reference_forward(nodes, edges, params, gcn_emb_dim, gcn_nodes_num, n_embd)
    assert out.shape == (batch, n_embd)
    assert jnp.allclose(out, ref, atol=1e-4, rtol=1e-3), \
        f"max abs err {jnp.max(jnp.abs(out - ref))}"

    # Single-graph path (original torch call shape): (N, 3) -> (1, n_embd)
    out1 = gcn_forward(nodes[0], edges, params, gcn_emb_dim, gcn_nodes_num, n_embd)
    out1 = jax.block_until_ready(out1)
    ref1 = reference_forward(nodes[0], edges, params, gcn_emb_dim, gcn_nodes_num, n_embd)
    assert out1.shape == (1, n_embd)
    assert jnp.allclose(out1, ref1, atol=1e-4, rtol=1e-3)

    print("KERNEL_OK")
</pallas_src>

<mosaic_0001>
module attributes {stable_mosaic.version = 11 : i64} {
  func.func @gcn_fused_kernel(%arg0: i32, %arg1: memref<4x48xf32, #tpu.memory_space<vmem>>, %arg2: memref<48x48xf32, #tpu.memory_space<vmem>>, %arg3: memref<1x48xf32, #tpu.memory_space<vmem>>, %arg4: memref<48x128xf32, #tpu.memory_space<vmem>>, %arg5: memref<1x128xf32, #tpu.memory_space<vmem>>, %arg6: memref<128x32xf32, #tpu.memory_space<vmem>>, %arg7: memref<1x32xf32, #tpu.memory_space<vmem>>, %arg8: memref<4x32xf32, #tpu.memory_space<vmem>>) attributes {dimension_semantics = [#tpu.dimension_semantics<arbitrary>], iteration_bounds = array<i64: 1>, scalar_prefetch = 0 : i64, scratch_operands = 0 : i64, tpu.core_type = #tpu.core_type<tc>, window_params = [{pipeline_mode = #tpu.pipeline_mode<synchronous>, transform_indices = @transform_0, window_bounds = array<i64: 4, 48>}, {pipeline_mode = #tpu.pipeline_mode<synchronous>, transform_indices = @transform_1, window_bounds = array<i64: 48, 48>}, {pipeline_mode = #tpu.pipeline_mode<synchronous>, transform_indices = @transform_2, window_bounds = array<i64: 1, 48>}, {pipeline_mode = #tpu.pipeline_mode<synchronous>, transform_indices = @transform_3, window_bounds = array<i64: 48, 128>}, {pipeline_mode = #tpu.pipeline_mode<synchronous>, transform_indices = @transform_4, window_bounds = array<i64: 1, 128>}, {pipeline_mode = #tpu.pipeline_mode<synchronous>, transform_indices = @transform_5, window_bounds = array<i64: 128, 32>}, {pipeline_mode = #tpu.pipeline_mode<synchronous>, transform_indices = @transform_6, window_bounds = array<i64: 1, 32>}, {pipeline_mode = #tpu.pipeline_mode<synchronous>, transform_indices = @transform_7, window_bounds = array<i64: 4, 32>}]} {
    %c0 = arith.constant 0 : index
    %c0_0 = arith.constant 0 : index
    %0 = vector.load %arg1[%c0, %c0_0] : memref<4x48xf32, #tpu.memory_space<vmem>>, vector<4x48xf32>
    %c0_1 = arith.constant 0 : index
    %c0_2 = arith.constant 0 : index
    %1 = vector.load %arg2[%c0_1, %c0_2] : memref<48x48xf32, #tpu.memory_space<vmem>>, vector<48x48xf32>
    %cst = arith.constant dense<0.000000e+00> : vector<4x48xf32>
    %2 = tpu.matmul %0, %1, %cst {dimension_numbers = #tpu.dot_dimension_numbers<[1], [0], [0], [1], [0, 0, 1, 1], [], []>} : vector<4x48xf32>, vector<48x48xf32>, vector<4x48xf32> -> vector<4x48xf32>
    %c0_3 = arith.constant 0 : index
    %c0_4 = arith.constant 0 : index
    %3 = vector.load %arg3[%c0_3, %c0_4] : memref<1x48xf32, #tpu.memory_space<vmem>>, vector<1x48xf32>
    %4 = vector.broadcast %3 : vector<1x48xf32> to vector<4x48xf32>
    %5 = arith.addf %2, %4 : vector<4x48xf32>
    %cst_5 = arith.constant 0.000000e+00 : f32
    %6 = vector.broadcast %cst_5 : f32 to vector<4x48xf32>
    %7 = arith.cmpf oge, %5, %6 : vector<4x48xf32>
    %cst_6 = arith.constant 1.000000e-01 : f32
    %8 = vector.broadcast %cst_6 : f32 to vector<4x48xf32>
    %9 = arith.mulf %8, %5 : vector<4x48xf32>
    %10 = arith.select %7, %5, %9 : vector<4x48xi1>, vector<4x48xf32>
    %c0_7 = arith.constant 0 : index
    %c0_8 = arith.constant 0 : index
    %11 = vector.load %arg4[%c0_7, %c0_8] : memref<48x128xf32, #tpu.memory_space<vmem>>, vector<48x128xf32>
    %cst_9 = arith.constant dense<0.000000e+00> : vector<4x128xf32>
    %12 = tpu.matmul %10, %11, %cst_9 {dimension_numbers = #tpu.dot_dimension_numbers<[1], [0], [0], [1], [0, 0, 1, 1], [], []>} : vector<4x48xf32>, vector<48x128xf32>, vector<4x128xf32> -> vector<4x128xf32>
    %c0_10 = arith.constant 0 : index
    %c0_11 = arith.constant 0 : index
    %13 = vector.load %arg5[%c0_10, %c0_11] : memref<1x128xf32, #tpu.memory_space<vmem>>, vector<1x128xf32>
    %14 = vector.broadcast %13 : vector<1x128xf32> to vector<4x128xf32>
    %15 = arith.addf %12, %14 : vector<4x128xf32>
    %c0_12 = arith.constant 0 : index
    %c0_13 = arith.constant 0 : index
    %16 = vector.load %arg6[%c0_12, %c0_13] : memref<128x32xf32, #tpu.memory_space<vmem>>, vector<128x32xf32>
    %cst_14 = arith.constant dense<0.000000e+00> : vector<4x32xf32>
    %17 = tpu.matmul %15, %16, %cst_14 {dimension_numbers = #tpu.dot_dimension_numbers<[1], [0], [0], [1], [0, 0, 1, 1], [], []>} : vector<4x128xf32>, vector<128x32xf32>, vector<4x32xf32> -> vector<4x32xf32>
    %c0_15 = arith.constant 0 : index
    %c0_16 = arith.constant 0 : index
    %18 = vector.load %arg7[%c0_15, %c0_16] : memref<1x32xf32, #tpu.memory_space<vmem>>, vector<1x32xf32>
    %19 = vector.broadcast %18 : vector<1x32xf32> to vector<4x32xf32>
    %20 = arith.addf %17, %19 : vector<4x32xf32>
    %c0_17 = arith.constant 0 : index
    %c0_18 = arith.constant 0 : index
    %21 = vector.load %arg8[%c0_17, %c0_18] : memref<4x32xf32, #tpu.memory_space<vmem>>, vector<4x32xf32>
    tpu.vector_store %arg8[%c0_17, %c0_18], %20 {strides = array<i32>} : memref<4x32xf32, #tpu.memory_space<vmem>>, vector<4x32xf32>,
    return
  }
  func.func @transform_0(%arg0: i32) -> (i32, i32) {
    %c0_i32 = arith.constant 0 : i32
    %c0_i32_0 = arith.constant 0 : i32
    %c0_i32_1 = arith.constant 0 : i32
    return %c0_i32, %c0_i32_0 : i32, i32
  }
  func.func @transform_1(%arg0: i32) -> (i32, i32) {
    %c0_i32 = arith.constant 0 : i32
    %c0_i32_0 = arith.constant 0 : i32
    %c0_i32_1 = arith.constant 0 : i32
    return %c0_i32, %c0_i32_0 : i32, i32
  }
  func.func @transform_2(%arg0: i32) -> (i32, i32) {
    %c0_i32 = arith.constant 0 : i32
    %c0_i32_0 = arith.constant 0 : i32
    %c0_i32_1 = arith.constant 0 : i32
    return %c0_i32, %c0_i32_0 : i32, i32
  }
  func.func @transform_3(%arg0: i32) -> (i32, i32) {
    %c0_i32 = arith.constant 0 : i32
    %c0_i32_0 = arith.constant 0 : i32
    %c0_i32_1 = arith.constant 0 : i32
    return %c0_i32, %c0_i32_0 : i32, i32
  }
  func.func @transform_4(%arg0: i32) -> (i32, i32) {
    %c0_i32 = arith.constant 0 : i32
    %c0_i32_0 = arith.constant 0 : i32
    %c0_i32_1 = arith.constant 0 : i32
    return %c0_i32, %c0_i32_0 : i32, i32
  }
  func.func @transform_5(%arg0: i32) -> (i32, i32) {
    %c0_i32 = arith.constant 0 : i32
    %c0_i32_0 = arith.constant 0 : i32
    %c0_i32_1 = arith.constant 0 : i32
    return %c0_i32, %c0_i32_0 : i32, i32
  }
  func.func @transform_6(%arg0: i32) -> (i32, i32) {
    %c0_i32 = arith.constant 0 : i32
    %c0_i32_0 = arith.constant 0 : i32
    %c0_i32_1 = arith.constant 0 : i32
    return %c0_i32, %c0_i32_0 : i32, i32
  }
  func.func @transform_7(%arg0: i32) -> (i32, i32) {
    %c0_i32 = arith.constant 0 : i32
    %c0_i32_0 = arith.constant 0 : i32
    %c0_i32_1 = arith.constant 0 : i32
    return %c0_i32, %c0_i32_0 : i32, i32
  }
}

</mosaic_0001>

<bundles_post_ra>
// kernel: tpu_custom_call.1
= control target key start
LH: loop header
LB: loop body
LE: loop exit
PB: predicated region body
PF: predicated region fallthrough
CT: control target
= control target key end

     0   :  { %v484_v3 = vmov 0.0|0.0   ;;  %vm485_vm0 = vmmov 0   ;;  %v486_v6 = vmov 0.0   ;;  %s655_s0 = inlined_call_operand.vmem [shape: f32[4,48], index: 0, kind: input, shape index: {}]   ;;  %s656_s1 = inlined_call_operand.vmem [shape: f32[48,48], index: 1, kind: input, shape index: {}]   ;;  %s657_s2 = inlined_call_operand.vmem [shape: f32[1,48], index: 2, kind: input, shape index: {}]   ;;  %s658_s3 = inlined_call_operand.vmem [shape: f32[48,128], index: 3, kind: input, shape index: {}]   ;;  %s659_s4 = inlined_call_operand.vmem [shape: f32[1,128], index: 4, kind: input, shape index: {}]   ;;  %s660_s5 = inlined_call_operand.vmem [shape: f32[128,32], index: 5, kind: input, shape index: {}]   ;;  %s661_s6 = inlined_call_operand.vmem [shape: f32[1,32], index: 6, kind: input, shape index: {}]   ;;  %s662_s7 = inlined_call_operand.hbm [shape: f32[4,32], index: 7, kind: output, shape index: {}]  }
   0x1   :  { %v28_v0 = vld [vmem:[%s656_s1] sm:$0xff]  ;;  %v29_v1 = vld [vmem:[%s656_s1 + $0x8] sm:$0xff]  ;;  %v30_v2 = vld [vmem:[%s656_s1 + $0x10] sm:$0xff]  ;;  %414 = vmatprep.subr.bf16.mxu1 %v484_v3  ;;  %361 = vmatprep.mubr.msk.f32.mxu1 %vm485_vm0, %v486_v6 }
   0x2   :  { %v415_v4 = vpack.c.bf16 %v29_v1, %v28_v0  ;;  %v31_v5 = vld [vmem:[%s656_s1 + $0x18] sm:$0xff]  ;;  %432 = vmatprep.subr.bf16.mxu0 %v484_v3  ;;  %411 = vmatprep.mubr.msk.f32.mxu0 %vm485_vm0, %v486_v6  ;;  %v32_v8 = vld [vmem:[%s656_s1 + $0x20] sm:$0xff]  ;;  %v33_v9 = vld [vmem:[%s656_s1 + $0x28] sm:$0xff] }
   0x3   :  { %v418_v7 = vpack.c.bf16 %v31_v5, %v30_v2 }
   0x4   :  { %416 = vmatpush3.bf16.msra.mxu1 %v415_v4 }
   0x5   :  { %417 = vmatprep.subr.bf16.mxu1 %v484_v3 }
   0x6   :  { %12 = vsyncpa [#allocation3], 0  ;;  %v421_v10 = vpack.c.bf16 %v33_v9, %v32_v8  ;;  %v118_v11 = vld [vmem:[%s658_s3] sm:$0xff]  ;;  %v119_v12 = vld [vmem:[%s658_s3 + $0x8] sm:$0xff]  ;;  %vm41_vm1 = vcmask 392192   ;;  %s487_s12 = smov [#allocation2]  }
   0x7   :  { %v27_v13 = vld [vmem:[%s655_s0] sm:$0xf]  ;;  %v424_v14 = vpack.c.bf16 %v119_v12, %v118_v11  ;;  %v120_v15 = vld [vmem:[%s658_s3 + $0x10] sm:$0xff]  ;;  %v121_v16 = vld [vmem:[%s658_s3 + $0x18] sm:$0xff]  ;;  %s305_s13 = sshll.u32 %s487_s12, 4  ;;  %vm297_vm3 = vcmask 257024   ;;  %s306_s13 = int_to_ptr.vmem [resolvable:$true] %s305_s13 }
   0x8   :  { %419 = vmatpush3.bf16.msra.mxu1 %v418_v7  ;;  %v427_v17 = vpack.c.bf16 %v121_v16, %v120_v15  ;;  %v122_v18 = vld [vmem:[%s658_s3 + $0x20] sm:$0xff]  ;;  %v123_v19 = vld [vmem:[%s658_s3 + $0x28] sm:$0xff]  ;;  %v206_v23 = vld [vmem:[%s660_s5 + $0x10] sm:$0xff]  ;;  %p465_p1 = scmp.lt.s32.totalorder %s306_s13, %s306_s13 }
   0x9   :  { %420 = vmatprep.subr.bf16.mxu1 %v484_v3  ;;  %v430_v20 = vpack.c.bf16 %v123_v19, %v122_v18  ;;  %v204_v21 = vld [vmem:[%s660_s5] sm:$0xff]  ;;  %v205_v22 = vld [vmem:[%s660_s5 + $0x8] sm:$0xff]  ;;  %v207_v25 = vld [vmem:[%s660_s5 + $0x18] sm:$0xff] }
   0xa   :  { %v433_v24 = vpack.c.bf16 %v205_v22, %v204_v21  ;;  %v436_v26 = vpack.c.bf16 %v207_v25, %v206_v23  ;;  %v208_v27 = vld [vmem:[%s660_s5 + $0x20] sm:$0xff]  ;;  %v209_v28 = vld [vmem:[%s660_s5 + $0x28] sm:$0xff]  ;;  %v210_v30 = vld [vmem:[%s660_s5 + $0x30] sm:$0xff] }
   0xb   :  { %v439_v29 = vpack.c.bf16 %v209_v28, %v208_v27  ;;  %v211_v31 = vld [vmem:[%s660_s5 + $0x38] sm:$0xff]  ;;  %v212_v33 = vld [vmem:[%s660_s5 + $0x40] sm:$0xff]  ;;  %v213_v34 = vld [vmem:[%s660_s5 + $0x48] sm:$0xff] }
   0xc   :  { %422 = vmatpush3.bf16.msra.mxu1 %v421_v10  ;;  %434 = vmatpush3.bf16.msra.mxu0 %v433_v24  ;;  %v442_v32 = vpack.c.bf16 %v211_v31, %v210_v30  ;;  %v445_v35 = vpack.c.bf16 %v213_v34, %v212_v33  ;;  %v214_v36 = vld [vmem:[%s660_s5 + $0x50] sm:$0xff]  ;;  %v215_v37 = vld [vmem:[%s660_s5 + $0x58] sm:$0xff]  ;;  %v216_v39 = vld [vmem:[%s660_s5 + $0x60] sm:$0xff] }
   0xd   :  { %423 = vmatprep.subr.bf16.mxu1 %v484_v3  ;;  %435 = vmatprep.subr.bf16.mxu0 %v484_v3  ;;  %v448_v38 = vpack.c.bf16 %v215_v37, %v214_v36  ;;  %v217_v40 = vld [vmem:[%s660_s5 + $0x68] sm:$0xff]  ;;  %v313_v42 = vld [vmem:[%s657_s2] ss:$0 sm:$0xff]  ;;  %v218_v48 = vld [vmem:[%s660_s5 + $0x70] sm:$0xff] }
   0xe   :  { %v451_v41 = vpack.c.bf16 %v217_v40, %v216_v39  ;;  %v219_v49 = vld [vmem:[%s660_s5 + $0x78] sm:$0xff]  ;;  %v315_v51 = vld [vmem:[%s659_s4] ss:$0 sm:$0xff]  ;;  %s460_s5 = scalar_lea.vmem %s306_s13, 64 }
   0xf   :  { %362 = vmatmul.mubr.msk.f32.vlgmr.msra.gmra.mrb[0].mxu1 %vm41_vm1, %v27_v13  ;;  %v454_v50 = vpack.c.bf16 %v219_v49, %v218_v48  ;;  %v317_v55 = vld [vmem:[%s661_s6] ss:$0 sm:$0xff]  ;;  %p461_p0 = scmp.ne.s32.totalorder %s306_s13, %s460_s5  ;;  %p466_p2 = scmp.lt.s32.totalorder %s460_s5, %s460_s5 }
  0x10   :  { %425 = vmatpush3.bf16.msra.mxu1 %v424_v14  ;;  %376 = vmatprep.mubr.msk.f32.mxu1 %vm485_vm0, %v486_v6 }
  0x11   :  { %426 = vmatprep.subr.bf16.mxu1 %v484_v3  ;;  %437 = vmatpush3.bf16.msra.mxu0 %v436_v26  ;;  %p467_p3 = por %p466_p2, %p465_p1 }
  0x12   :  { %438 = vmatprep.subr.bf16.mxu0 %v484_v3 }
  0x13   :  { %p468_p4 = pnand %p467_p3, %p461_p0 }
  0x14   :  { %428 = vmatpush3.bf16.msra.mxu1 %v427_v17 }
  0x15   :  { %429 = vmatprep.subr.bf16.mxu1 %v484_v3  ;;  %440 = vmatpush3.bf16.msra.mxu0 %v439_v29 }
  0x16   :  { %441 = vmatprep.subr.bf16.mxu0 %v484_v3 }
  0x18   :  { %431 = vmatpush3.bf16.msra.mxu1 %v430_v20 }
  0x19   :  { %443 = vmatpush3.bf16.msra.mxu0 %v442_v32 }
  0x1a   :  { %444 = vmatprep.subr.bf16.mxu0 %v484_v3 }
  0x1d   :  { %446 = vmatpush3.bf16.msra.mxu0 %v445_v35 }
  0x1e   :  { %447 = vmatprep.subr.bf16.mxu0 %v484_v3 }
  0x21   :  { %449 = vmatpush3.bf16.msra.mxu0 %v448_v38 }
  0x22   :  { %450 = vmatprep.subr.bf16.mxu0 %v484_v3 }
  0x25   :  { %452 = vmatpush3.bf16.msra.mxu0 %v451_v41 }
  0x26   :  { %453 = vmatprep.subr.bf16.mxu0 %v484_v3 }
  0x29   :  { %455 = vmatpush3.bf16.msra.mxu0 %v454_v50 }
  0xe2   :  { %v111_v43 = vpop.f32.mrb[0].mxu1 }
  0xe3   :  { %v112_v44 = vadd.f32 %v313_v42, %v111_v43  ;;  %v363_v45 = vpop.f32.mrb[1].mxu1 }
  0xe5   :  { %vm115_vm2 = vcmp.ge.f32.partialorder %v112_v44, 0.0  ;;  %v116_v46 = vmul.f32 0.1, %v112_v44 }
  0xe7   :  { %v117_v47 = vsel %vm115_vm2, %v112_v44, %v116_v46 }
  0xe8   :  { %377 = vmatmul.mubr.msk.f32.vlgmr.msra.gmra.mrb[2].mxu1 %vm41_vm1, %v117_v47 }
 0x1bb   :  { %v200_v52 = vpop.f32.mrb[2].mxu1 }
 0x1bc   :  { %v201_v53 = vadd.f32 %v315_v51, %v200_v52  ;;  %v378_v54 = vpop.f32.mrb[3].mxu1 }
 0x1be   :  { %412 = vmatmul.mubr.f32.vlgmr.msra.gmra.mrb[0].mxu0 %v201_v53 }
 0x291   :  { %v293_v56 = vpop.f32.mrb[0].mxu0 }
 0x292   :  { %v294_v57 = vadd.f32 %v317_v55, %v293_v56  ;;  %v413_v58 = vpop.f32.mrb[1].mxu0 }
 0x294   :  { %298 = vst.msk [vmem:[#allocation2] sm:$0xf] %vm297_vm3, %v294_v57 }
 0x295   :  { %471 = shalt.err (!%p468_p4)
}
 0x296   :  { %s472_s15 = scalar_lea.hbm %s662_s7, 64 }
 0x297   :  { %p473_p5 = scmp.ne.s32.totalorder %s662_s7, %s472_s15  ;;  %p476_p6 = scmp.lt.u32.totalorder %s472_s15, %s662_s7 }
 0x299   :  { %p478_p7 = pnand %p476_p6, %p473_p5 }
 0x29b   :  { %481 = shalt.err (!%p478_p7)
}
 0x29c   :  { %308 = dma.vmem_to_hbm [thread:$0]  %s306_s13, 64, %s662_s7, [#allocation3]  }
 0x29d   :  { %482 = dma.done.wait [#allocation3], 64  }
 0x29e   :  { %483 = vsyncadd [#allocation3], 4294967232 }
 0x29f   :  { %312 = vsyncpa [#allocation3], 1 }

</bundles_post_ra>
